<compile_context>
chip_gen: v7x
topology: tpu7x:2x2x1
jax: 0.10.0
libtpu: 0.0.40
codegen_flags: <defaults>
</compile_context>

<pallas_src>
import jax
import jax.numpy as jnp
from jax.experimental import pallas as pl
from jax.experimental.pallas import tpu as pltpu

IN_FEATURES = 784          # 28 * 28  (multiple of 16 -> bf16 sublane friendly)
HIDDEN = 256
OUT_FEATURES = 10
OUT_PAD = 128              # lane-dense padded output width (stores full vregs)


def mlp_kernel(x_ref, w1_ref, b1_ref, w2_ref, b2_ref, o_ref):
    # layer1: (TB, 784)bf16 @ (784, 256)bf16 -> f32 acc, + bias, relu
    h = jnp.dot(x_ref[...], w1_ref[...], preferred_element_type=jnp.float32)
    h = jnp.maximum(h + b1_ref[...], 0.0)
    # layer2: (TB, 256)bf16 @ (256, 128)bf16 -> f32 acc, + bias
    out = jnp.dot(h.astype(jnp.bfloat16), w2_ref[...],
                  preferred_element_type=jnp.float32)
    o_ref[...] = (out + b2_ref[...]).astype(o_ref.dtype)


def prepare_params(w1, b1, w2, b2):
    """One-time weight prep (bf16 cast + output padding), off the forward path.

    w1: (784, 256), b1: (256,), w2: (256, 10), b2: (10,)  -- (in, out) layout.
    """
    w1p = w1.astype(jnp.bfloat16)                               # (784, 256), no K pad
    b1r = b1.reshape(1, HIDDEN).astype(jnp.float32)             # (1, 256)
    w2p = (jnp.zeros((HIDDEN, OUT_PAD), jnp.float32)
           .at[:, :OUT_FEATURES].set(w2)).astype(jnp.bfloat16)  # (256, 128)
    b2p = (jnp.zeros((1, OUT_PAD), jnp.float32)
           .at[:, :OUT_FEATURES].set(b2))                       # (1, 128)
    return w1p, b1r, w2p, b2p


def _round_up(x, m):
    return (x + m - 1) // m * m


def _pick_batch_tile(B):
    """Batch-tile size: full-dim for small batches, ~512 rows otherwise,
    keeping >=2 grid steps when possible so v7x can use both TensorCores."""
    if B <= 256:
        return B                     # single full-dim block, no padded rows
    return min(512, _round_up(pl.cdiv(B, 2), 16))


def network_forward(x, w1p, b1r, w2p, b2p):
    """x: (B, 1, 28, 28) or anything flattening to (-1, 784). Returns (B, 10) f32."""
    x2d = x.reshape(-1, IN_FEATURES).astype(jnp.bfloat16)   # cast first, no f32 pad
    B = x2d.shape[0]
    tb = _pick_batch_tile(B)
    grid = (pl.cdiv(B, tb),)

    out_padded = pl.pallas_call(
        mlp_kernel,
        out_shape=jax.ShapeDtypeStruct((B, OUT_PAD), jnp.bfloat16),
        grid_spec=pltpu.PrefetchScalarGridSpec(
            num_scalar_prefetch=0,
            grid=grid,
            in_specs=[
                pl.BlockSpec((tb, IN_FEATURES), lambda i: (i, 0)),       # x tile
                pl.BlockSpec((IN_FEATURES, HIDDEN), lambda i: (0, 0)),   # w1 resident
                pl.BlockSpec((1, HIDDEN), lambda i: (0, 0)),             # b1 resident
                pl.BlockSpec((HIDDEN, OUT_PAD), lambda i: (0, 0)),       # w2 resident
                pl.BlockSpec((1, OUT_PAD), lambda i: (0, 0)),            # b2 resident
            ],
            out_specs=pl.BlockSpec((tb, OUT_PAD), lambda i: (i, 0)),
        ),
        compiler_params=pltpu.CompilerParams(
            dimension_semantics=("parallel",),
        ),
    )(x2d, w1p, b1r, w2p, b2p)

    # tiny (B, 10) slice + cast; padded columns are zeros and are dropped here
    return out_padded[:, :OUT_FEATURES].astype(jnp.float32)


def init_params(key):
    """Deterministic init matching nn.Linear's U(-1/sqrt(fan_in), 1/sqrt(fan_in))."""
    k1, k2, k3, k4 = jax.random.split(key, 4)
    bound1 = 1.0 / jnp.sqrt(jnp.float32(IN_FEATURES))
    bound2 = 1.0 / jnp.sqrt(jnp.float32(HIDDEN))
    # weights stored transposed relative to torch, i.e. (in, out), so kernel does x @ W
    w1 = jax.random.uniform(k1, (IN_FEATURES, HIDDEN), jnp.float32, -bound1, bound1)
    b1 = jax.random.uniform(k2, (HIDDEN,), jnp.float32, -bound1, bound1)
    w2 = jax.random.uniform(k3, (HIDDEN, OUT_FEATURES), jnp.float32, -bound2, bound2)
    b2 = jax.random.uniform(k4, (OUT_FEATURES,), jnp.float32, -bound2, bound2)
    return w1, b1, w2, b2


if __name__ == "__main__":
    key = jax.random.PRNGKey(0)
    kx, kp = jax.random.split(key)
    # small batch of MNIST-shaped inputs
    x = jax.random.normal(kx, (8, 1, 28, 28), jnp.float32)
    w1, b1, w2, b2 = init_params(kp)

    # one-time weight prep (bf16 cast + output-column padding)
    w1p, b1r, w2p, b2p = prepare_params(w1, b1, w2, b2)

    fwd = jax.jit(network_forward)
    out = fwd(x, w1p, b1r, w2p, b2p)
    out = jax.block_until_ready(out)

    # correctness check against a plain-JAX reference using the same bf16
    # rounding of inputs/weights/hidden activations (f32 accumulation);
    # kernel output is stored as bf16, so use a correspondingly looser tol
    x2d = x.reshape(-1, IN_FEATURES)
    xb = x2d.astype(jnp.bfloat16).astype(jnp.float32)
    w1b = w1.astype(jnp.bfloat16).astype(jnp.float32)
    w2b = w2.astype(jnp.bfloat16).astype(jnp.float32)
    h = jnp.maximum(xb @ w1b + b1, 0.0)
    h = h.astype(jnp.bfloat16).astype(jnp.float32)
    ref = h @ w2b + b2

    assert out.shape == (8, OUT_FEATURES), out.shape
    assert jnp.allclose(out, ref, atol=2e-2, rtol=2e-2), "mismatch vs reference"

    print("KERNEL_OK")
</pallas_src>

<mosaic_0001>
module attributes {stable_mosaic.version = 11 : i64} {
  func.func @mlp_kernel(%arg0: i32, %arg1: memref<8x784xbf16, #tpu.memory_space<vmem>>, %arg2: memref<784x256xbf16, #tpu.memory_space<vmem>>, %arg3: memref<1x256xf32, #tpu.memory_space<vmem>>, %arg4: memref<256x128xbf16, #tpu.memory_space<vmem>>, %arg5: memref<1x128xf32, #tpu.memory_space<vmem>>, %arg6: memref<8x128xbf16, #tpu.memory_space<vmem>>) attributes {dimension_semantics = [#tpu.dimension_semantics<parallel>], iteration_bounds = array<i64: 1>, scalar_prefetch = 0 : i64, scratch_operands = 0 : i64, tpu.core_type = #tpu.core_type<tc>, window_params = [{transform_indices = @transform_0, window_bounds = array<i64: 8, 784>}, {pipeline_mode = #tpu.pipeline_mode<synchronous>, transform_indices = @transform_1, window_bounds = array<i64: 784, 256>}, {pipeline_mode = #tpu.pipeline_mode<synchronous>, transform_indices = @transform_2, window_bounds = array<i64: 1, 256>}, {pipeline_mode = #tpu.pipeline_mode<synchronous>, transform_indices = @transform_3, window_bounds = array<i64: 256, 128>}, {pipeline_mode = #tpu.pipeline_mode<synchronous>, transform_indices = @transform_4, window_bounds = array<i64: 1, 128>}, {transform_indices = @transform_5, window_bounds = array<i64: 8, 128>}]} {
    %c0 = arith.constant 0 : index
    %c0_0 = arith.constant 0 : index
    %0 = vector.load %arg1[%c0, %c0_0] : memref<8x784xbf16, #tpu.memory_space<vmem>>, vector<8x784xbf16>
    %c0_1 = arith.constant 0 : index
    %c0_2 = arith.constant 0 : index
    %1 = vector.load %arg2[%c0_1, %c0_2] : memref<784x256xbf16, #tpu.memory_space<vmem>>, vector<784x256xbf16>
    %cst = arith.constant dense<0.000000e+00> : vector<8x256xf32>
    %2 = tpu.matmul %0, %1, %cst {dimension_numbers = #tpu.dot_dimension_numbers<[1], [0], [0], [1], [0, 0, 1, 1], [], []>} : vector<8x784xbf16>, vector<784x256xbf16>, vector<8x256xf32> -> vector<8x256xf32>
    %c0_3 = arith.constant 0 : index
    %c0_4 = arith.constant 0 : index
    %3 = vector.load %arg3[%c0_3, %c0_4] : memref<1x256xf32, #tpu.memory_space<vmem>>, vector<1x256xf32>
    %4 = vector.broadcast %3 : vector<1x256xf32> to vector<8x256xf32>
    %5 = arith.addf %2, %4 : vector<8x256xf32>
    %cst_5 = arith.constant 0.000000e+00 : f32
    %6 = vector.broadcast %cst_5 : f32 to vector<8x256xf32>
    %7 = arith.maximumf %5, %6 : vector<8x256xf32>
    %8 = arith.truncf %7 : vector<8x256xf32> to vector<8x256xbf16>
    %c0_6 = arith.constant 0 : index
    %c0_7 = arith.constant 0 : index
    %9 = vector.load %arg4[%c0_6, %c0_7] : memref<256x128xbf16, #tpu.memory_space<vmem>>, vector<256x128xbf16>
    %cst_8 = arith.constant dense<0.000000e+00> : vector<8x128xf32>
    %10 = tpu.matmul %8, %9, %cst_8 {dimension_numbers = #tpu.dot_dimension_numbers<[1], [0], [0], [1], [0, 0, 1, 1], [], []>} : vector<8x256xbf16>, vector<256x128xbf16>, vector<8x128xf32> -> vector<8x128xf32>
    %c0_9 = arith.constant 0 : index
    %c0_10 = arith.constant 0 : index
    %11 = vector.load %arg5[%c0_9, %c0_10] : memref<1x128xf32, #tpu.memory_space<vmem>>, vector<1x128xf32>
    %12 = vector.broadcast %11 : vector<1x128xf32> to vector<8x128xf32>
    %13 = arith.addf %10, %12 : vector<8x128xf32>
    %14 = arith.truncf %13 : vector<8x128xf32> to vector<8x128xbf16>
    %c0_11 = arith.constant 0 : index
    %c0_12 = arith.constant 0 : index
    %15 = vector.load %arg6[%c0_11, %c0_12] : memref<8x128xbf16, #tpu.memory_space<vmem>>, vector<8x128xbf16>
    tpu.vector_store %arg6[%c0_11, %c0_12], %14 {strides = array<i32>} : memref<8x128xbf16, #tpu.memory_space<vmem>>, vector<8x128xbf16>,
    return
  }
  func.func @transform_0(%arg0: i32) -> (i32, i32) {
    %c0_i32 = arith.constant 0 : i32
    %c0_i32_0 = arith.constant 0 : i32
    return %arg0, %c0_i32 : i32, i32
  }
  func.func @transform_1(%arg0: i32) -> (i32, i32) {
    %c0_i32 = arith.constant 0 : i32
    %c0_i32_0 = arith.constant 0 : i32
    %c0_i32_1 = arith.constant 0 : i32
    return %c0_i32, %c0_i32_0 : i32, i32
  }
  func.func @transform_2(%arg0: i32) -> (i32, i32) {
    %c0_i32 = arith.constant 0 : i32
    %c0_i32_0 = arith.constant 0 : i32
    %c0_i32_1 = arith.constant 0 : i32
    return %c0_i32, %c0_i32_0 : i32, i32
  }
  func.func @transform_3(%arg0: i32) -> (i32, i32) {
    %c0_i32 = arith.constant 0 : i32
    %c0_i32_0 = arith.constant 0 : i32
    %c0_i32_1 = arith.constant 0 : i32
    return %c0_i32, %c0_i32_0 : i32, i32
  }
  func.func @transform_4(%arg0: i32) -> (i32, i32) {
    %c0_i32 = arith.constant 0 : i32
    %c0_i32_0 = arith.constant 0 : i32
    %c0_i32_1 = arith.constant 0 : i32
    return %c0_i32, %c0_i32_0 : i32, i32
  }
  func.func @transform_5(%arg0: i32) -> (i32, i32) {
    %c0_i32 = arith.constant 0 : i32
    %c0_i32_0 = arith.constant 0 : i32
    return %arg0, %c0_i32 : i32, i32
  }
}

</mosaic_0001>

<bundles_post_ra>
// kernel: network_forward.1
= control target key start
LH: loop header
LB: loop body
LE: loop exit
PB: predicated region body
PF: predicated region fallthrough
CT: control target
= control target key end

     0   :  { %10 = vsyncpa [#allocation3], 0  ;;  %s1370_s18 = smov [#allocation2]   ;;  %s1497_s0 = inlined_call_operand.vmem [shape: bf16[8,784], index: 0, kind: input, shape index: {}]   ;;  %s1498_s1 = inlined_call_operand.hbm [shape: bf16[784,256], index: 1, kind: input, shape index: {}]   ;;  %s1499_s2 = inlined_call_operand.vmem [shape: f32[1,256], index: 2, kind: input, shape index: {}]   ;;  %s1500_s3 = inlined_call_operand.vmem [shape: bf16[256,128], index: 3, kind: input, shape index: {}]   ;;  %s1501_s4 = inlined_call_operand.vmem [shape: f32[1,128], index: 4, kind: input, shape index: {}]   ;;  %s1502_s5 = inlined_call_operand.vmem [shape: bf16[8,128], index: 5, kind: output, shape index: {}]  }
   0x1   :  { %s18_s19 = sshll.u32 %s1370_s18, 4  ;;  %s1346_s22 = scalar_lea.hbm %s1498_s1, 12544  ;;  %s19_s19 = int_to_ptr.vmem [resolvable:$true] %s18_s19 }
   0x2   :  { %p1347_p0 = scmp.ne.s32.totalorder %s1498_s1, %s1346_s22  ;;  %p1350_p1 = scmp.lt.u32.totalorder %s1346_s22, %s1498_s1 }
   0x4   :  { %p1352_p2 = pnand %p1350_p1, %p1347_p0 }
   0x6   :  { %1355 = shalt.err (!%p1352_p2)
}
   0x7   :  { %s1356_s27 = scalar_lea.vmem %s19_s19, 12544  ;;  %p1361_p4 = scmp.lt.s32.totalorder %s19_s19, %s19_s19 }
   0x8   :  { %p1357_p3 = scmp.ne.s32.totalorder %s19_s19, %s1356_s27  ;;  %p1362_p5 = scmp.lt.s32.totalorder %s1356_s27, %s1356_s27 }
   0xa   :  { %p1363_p6 = por %p1362_p5, %p1361_p4 }
   0xc   :  { %p1364_p7 = pnand %p1363_p6, %p1357_p3 }
   0xe   :  { %1367 = shalt.err (!%p1364_p7)
}
   0xf   :  { %s1371_s28 = smov 128   ;;  %s1372_s29 = smov 8  }
  0x10   :  { %24 = dma.hbm_to_vmem [thread:$0]  %s1498_s1, 12544, %s19_s19, [#allocation3], %s1371_s28, %s1371_s28, %s1372_s29  }
  0x11   :  { %1368 = dma.done.wait [#allocation3], 12544  }
  0x12   :  { %1369 = vsyncadd [#allocation3], 4294954752  ;;  %v1176_v0 = vld [vmem:[#allocation2 + $0x104] ss:$8 sps:$4 sm:$0xff]   ;;  %v1178_v1 = vld [vmem:[#allocation2 + $0x100] ss:$8 sps:$4 sm:$0xff]  }
  0x13   :  { %708 = vmatprep.subr.bf16.mxu0 %v1176_v0  ;;  %v1179_v2 = vld [vmem:[#allocation2 + $0x114] ss:$8 sps:$4 sm:$0xff]   ;;  %v1181_v3 = vld [vmem:[#allocation2 + $0x110] ss:$8 sps:$4 sm:$0xff]   ;;  %v1182_v4 = vld [vmem:[#allocation2 + $0x124] ss:$8 sps:$4 sm:$0xff]  }
  0x14   :  { %709 = vmatpush1.bf16.msra.mxu0 %v1178_v1  ;;  %v1184_v5 = vld [vmem:[#allocation2 + $0x120] ss:$8 sps:$4 sm:$0xff]   ;;  %v1185_v6 = vld [vmem:[#allocation2 + $0x134] ss:$8 sps:$4 sm:$0xff]   ;;  %v1187_v7 = vld [vmem:[#allocation2 + $0x130] ss:$8 sps:$4 sm:$0xff]  }
  0x15   :  { %710 = vmatprep.subr.bf16.mxu0 %v1179_v2  ;;  %v1188_v8 = vld [vmem:[#allocation2 + $0x144] ss:$8 sps:$4 sm:$0xff]   ;;  %v1190_v9 = vld [vmem:[#allocation2 + $0x140] ss:$8 sps:$4 sm:$0xff]   ;;  %v1191_v10 = vld [vmem:[#allocation2 + $0x154] ss:$8 sps:$4 sm:$0xff]  }
  0x16   :  { %v1193_v11 = vld [vmem:[#allocation2 + $0x150] ss:$8 sps:$4 sm:$0xff]   ;;  %v1218_v12 = vld [vmem:[#allocation2 + $0x4] ss:$8 sps:$4 sm:$0xff]   ;;  %v1220_v13 = vld [vmem:[#allocation2] ss:$8 sps:$4 sm:$0xff]  }
  0x17   :  { %v1194_v14 = vld [vmem:[#allocation2 + $0x164] ss:$8 sps:$4 sm:$0xff]   ;;  %667 = vmatprep.subr.bf16.mxu1 %v1218_v12  ;;  %v1224_v15 = vld [vmem:[#allocation2 + $0x14] ss:$8 sps:$4 sm:$0xff]   ;;  %v1226_v16 = vld [vmem:[#allocation2 + $0x10] ss:$8 sps:$4 sm:$0xff]  }
  0x18   :  { %711 = vmatpush1.bf16.msra.mxu0 %v1181_v3  ;;  %668 = vmatpush1.bf16.msra.mxu1 %v1220_v13  ;;  %v1196_v17 = vld [vmem:[#allocation2 + $0x160] ss:$8 sps:$4 sm:$0xff]   ;;  %v1197_v18 = vld [vmem:[#allocation2 + $0x174] ss:$8 sps:$4 sm:$0xff]   ;;  %v1230_v19 = vld [vmem:[#allocation2 + $0x24] ss:$8 sps:$4 sm:$0xff]  }
  0x19   :  { %712 = vmatprep.subr.bf16.mxu0 %v1182_v4  ;;  %669 = vmatprep.subr.bf16.mxu1 %v1224_v15  ;;  %v1419_v20 = vld [vmem:[%s1497_s0 + $0x8] sm:$0xff]  ;;  %v1199_v21 = vld [vmem:[#allocation2 + $0x170] ss:$8 sps:$4 sm:$0xff]   ;;  %v1238_v24 = vld [vmem:[#allocation2 + $0x34] ss:$8 sps:$4 sm:$0xff]   ;;  %vm663_vm0 = vcmask 130048  }
  0x1a   :  { %v1232_v22 = vld [vmem:[#allocation2 + $0x20] ss:$8 sps:$4 sm:$0xff]   ;;  %v1020_v23 = vcombine.high %v1419_v20, %v1419_v20  ;;  %v1200_v25 = vld [vmem:[#allocation2 + $0x184] ss:$8 sps:$4 sm:$0xff]   ;;  %v1240_v27 = vld [vmem:[#allocation2 + $0x30] ss:$8 sps:$4 sm:$0xff]   ;;  %v1019_v60 = vcombine.low %v1419_v20, %v1419_v20 }
  0x1b   :  { %v1202_v26 = vld [vmem:[#allocation2 + $0x180] ss:$8 sps:$4 sm:$0xff]   ;;  %v1244_v28 = vld [vmem:[#allocation2 + $0x44] ss:$8 sps:$4 sm:$0xff]   ;;  %v1203_v29 = vld [vmem:[#allocation2 + $0x194] ss:$8 sps:$4 sm:$0xff]  }
  0x1c   :  { %713 = vmatpush1.bf16.msra.mxu0 %v1184_v5  ;;  %670 = vmatpush1.bf16.msra.mxu1 %v1226_v16  ;;  %v1205_v30 = vld [vmem:[#allocation2 + $0x190] ss:$8 sps:$4 sm:$0xff]   ;;  %v1246_v31 = vld [vmem:[#allocation2 + $0x40] ss:$8 sps:$4 sm:$0xff]   ;;  %v1250_v32 = vld [vmem:[#allocation2 + $0x54] ss:$8 sps:$4 sm:$0xff]  }
  0x1d   :  { %714 = vmatprep.subr.bf16.mxu0 %v1185_v6  ;;  %671 = vmatprep.subr.bf16.mxu1 %v1230_v19  ;;  %v1206_v33 = vld [vmem:[#allocation2 + $0x1a4] ss:$8 sps:$4 sm:$0xff]   ;;  %v1208_v34 = vld [vmem:[#allocation2 + $0x1a0] ss:$8 sps:$4 sm:$0xff]   ;;  %v1252_v35 = vld [vmem:[#allocation2 + $0x50] ss:$8 sps:$4 sm:$0xff]  }
  0x1e   :  { %740 = vmatprep.mubr.bf16.mxu0 %v1020_v23  ;;  %v1256_v36 = vld [vmem:[#allocation2 + $0x64] ss:$8 sps:$4 sm:$0xff]   ;;  %v1209_v37 = vld [vmem:[#allocation2 + $0x1b4] ss:$8 sps:$4 sm:$0xff]   ;;  %v1211_v38 = vld [vmem:[#allocation2 + $0x1b0] ss:$8 sps:$4 sm:$0xff]  }
  0x1f   :  { %v1258_v39 = vld [vmem:[#allocation2 + $0x60] ss:$8 sps:$4 sm:$0xff]   ;;  %v1262_v40 = vld [vmem:[#allocation2 + $0x74] ss:$8 sps:$4 sm:$0xff]   ;;  %v1212_v41 = vld [vmem:[#allocation2 + $0x1c4] ss:$8 sps:$4 sm:$0xff]  }
  0x20   :  { %715 = vmatpush1.bf16.msra.mxu0 %v1187_v7  ;;  %672 = vmatpush1.bf16.msra.mxu1 %v1232_v22  ;;  %v1214_v42 = vld [vmem:[#allocation2 + $0x1c0] ss:$8 sps:$4 sm:$0xff]   ;;  %v1264_v43 = vld [vmem:[#allocation2 + $0x70] ss:$8 sps:$4 sm:$0xff]   ;;  %v1268_v44 = vld [vmem:[#allocation2 + $0x84] ss:$8 sps:$4 sm:$0xff]  }
  0x21   :  { %716 = vmatprep.subr.bf16.mxu0 %v1188_v8  ;;  %673 = vmatprep.subr.bf16.mxu1 %v1238_v24  ;;  %v1215_v45 = vld [vmem:[#allocation2 + $0x1d4] ss:$8 sps:$4 sm:$0xff]   ;;  %v1217_v46 = vld [vmem:[#allocation2 + $0x1d0] ss:$8 sps:$4 sm:$0xff]   ;;  %v1270_v47 = vld [vmem:[#allocation2 + $0x80] ss:$8 sps:$4 sm:$0xff]  }
  0x22   :  { %v1274_v48 = vld [vmem:[#allocation2 + $0x94] ss:$8 sps:$4 sm:$0xff]   ;;  %v1221_v49 = vld [vmem:[#allocation2 + $0x1e4] ss:$8 sps:$4 sm:$0xff]   ;;  %v1223_v50 = vld [vmem:[#allocation2 + $0x1e0] ss:$8 sps:$4 sm:$0xff]  }
  0x23   :  { %v1276_v51 = vld [vmem:[#allocation2 + $0x90] ss:$8 sps:$4 sm:$0xff]   ;;  %v1280_v52 = vld [vmem:[#allocation2 + $0xa4] ss:$8 sps:$4 sm:$0xff]   ;;  %v1227_v53 = vld [vmem:[#allocation2 + $0x1f4] ss:$8 sps:$4 sm:$0xff]  }
  0x24   :  { %717 = vmatpush1.bf16.msra.mxu0 %v1190_v9  ;;  %674 = vmatpush1.bf16.msra.mxu1 %v1240_v27  ;;  %v1229_v54 = vld [vmem:[#allocation2 + $0x1f0] ss:$8 sps:$4 sm:$0xff]   ;;  %v1282_v55 = vld [vmem:[#allocation2 + $0xa0] ss:$8 sps:$4 sm:$0xff]   ;;  %v1286_v56 = vld [vmem:[#allocation2 + $0xb4] ss:$8 sps:$4 sm:$0xff]  }
  0x25   :  { %718 = vmatprep.subr.bf16.mxu0 %v1191_v10  ;;  %675 = vmatprep.subr.bf16.mxu1 %v1244_v28  ;;  %v1237_v57 = vld [vmem:[#allocation2 + $0x204] ss:$8 sps:$4 sm:$0xff]   ;;  %v1235_v58 = vld [vmem:[#allocation2 + $0x200] ss:$8 sps:$4 sm:$0xff]   ;;  %v1288_v61 = vld [vmem:[#allocation2 + $0xb0] ss:$8 sps:$4 sm:$0xff]  }
  0x26   :  { %v35_v59 = vld [vmem:[%s1497_s0] sm:$0xff]  ;;  %v1243_v0 = vld [vmem:[#allocation2 + $0x214] ss:$8 sps:$4 sm:$0xff]   ;;  %v1241_v1 = vld [vmem:[#allocation2 + $0x210] ss:$8 sps:$4 sm:$0xff]   ;;  %v1373_v24 = vmov 0  }
  0x27   :  { %v1018_v62 = vcombine.high %v35_v59, %v35_v59  ;;  %v1292_v63 = vld [vmem:[#allocation2 + $0xc4] ss:$8 sps:$4 sm:$0xff]   ;;  %v1294_v2 = vld [vmem:[#allocation2 + $0xc0] ss:$8 sps:$4 sm:$0xff]   ;;  %v1431_v3 = vld [vmem:[%s1497_s0 + $0x10] sm:$0xff]  ;;  %v1017_v19 = vcombine.low %v35_v59, %v35_v59 }
  0x28   :  { %719 = vmatpush1.bf16.msra.mxu0 %v1193_v11  ;;  %676 = vmatpush1.bf16.msra.mxu1 %v1246_v31  ;;  %v1298_v4 = vld [vmem:[#allocation2 + $0xd4] ss:$8 sps:$4 sm:$0xff]   ;;  %v1022_v5 = vcombine.high %v1431_v3, %v1431_v3  ;;  %v1249_v6 = vld [vmem:[#allocation2 + $0x224] ss:$8 sps:$4 sm:$0xff]   ;;  %v1247_v7 = vld [vmem:[#allocation2 + $0x220] ss:$8 sps:$4 sm:$0xff]  }
  0x29   :  { %720 = vmatprep.subr.bf16.mxu0 %v1194_v14  ;;  %677 = vmatprep.subr.bf16.mxu1 %v1250_v32  ;;  %v1255_v8 = vld [vmem:[#allocation2 + $0x234] ss:$8 sps:$4 sm:$0xff]   ;;  %v1300_v9 = vld [vmem:[#allocation2 + $0xd0] ss:$8 sps:$4 sm:$0xff]   ;;  %v1304_v10 = vld [vmem:[#allocation2 + $0xe4] ss:$8 sps:$4 sm:$0xff]  }
  0x2a   :  { %699 = vmatprep.mubr.bf16.mxu1 %v1018_v62  ;;  %v1306_v11 = vld [vmem:[#allocation2 + $0xe0] ss:$8 sps:$4 sm:$0xff]   ;;  %v1253_v12 = vld [vmem:[#allocation2 + $0x230] ss:$8 sps:$4 sm:$0xff]   ;;  %v1310_v13 = vld [vmem:[#allocation2 + $0xf4] ss:$8 sps:$4 sm:$0xff]  }
  0x2b   :  { %v1261_v14 = vld [vmem:[#allocation2 + $0x244] ss:$8 sps:$4 sm:$0xff]   ;;  %v1312_v15 = vld [vmem:[#allocation2 + $0xf0] ss:$8 sps:$4 sm:$0xff]   ;;  %v1259_v16 = vld [vmem:[#allocation2 + $0x240] ss:$8 sps:$4 sm:$0xff]  }
  0x2c   :  { %721 = vmatpush1.bf16.msra.mxu0 %v1196_v17  ;;  %678 = vmatpush1.bf16.msra.mxu1 %v1252_v35  ;;  %v1323_v17 = vld [vmem:[#allocation2 + $0x304] ss:$8 sps:$4 sm:$0xff]   ;;  %v1321_v20 = vld [vmem:[#allocation2 + $0x300] ss:$8 sps:$4 sm:$0xff]   ;;  %v1329_v27 = vld [vmem:[%s1497_s0 + $0x18] ss:$0 sps:$4 sm:$0xff]  }
  0x2d   :  { %722 = vmatprep.subr.bf16.mxu0 %v1197_v18  ;;  %679 = vmatprep.subr.bf16.mxu1 %v1256_v36  ;;  %v1267_v18 = vld [vmem:[#allocation2 + $0x254] ss:$8 sps:$4 sm:$0xff]   ;;  %v1330_v22 = vld [vmem:[%s1500_s3 + $0x40] sm:$0xff]   ;;  %v1333_v32 = vld [vmem:[%s1500_s3 + $0x8] sm:$0xff]  }
  0x2e   :  { %v1273_v23 = vld [vmem:[#allocation2 + $0x264] ss:$8 sps:$4 sm:$0xff]   ;;  %v1291_v35 = vld [vmem:[#allocation2 + $0x294] ss:$8 sps:$4 sm:$0xff]  }
  0x2f   :  { %v1331_v28 = vld [vmem:[%s1500_s3] sm:$0xff]   ;;  %v1335_v36 = vld [vmem:[%s1500_s3 + $0x10] sm:$0xff]   ;;  %v1344_v59 = vld [vmem:[%s1500_s3 + $0x78] sm:$0xff]  }
  0x30   :  { %723 = vmatpush1.bf16.msra.mxu0 %v1199_v21  ;;  %680 = vmatpush1.bf16.msra.mxu1 %v1258_v39  ;;  %v1265_v21 = vld [vmem:[#allocation2 + $0x250] ss:$8 sps:$4 sm:$0xff]   ;;  %v1285_v31 = vld [vmem:[#allocation2 + $0x284] ss:$8 sps:$4 sm:$0xff]   ;;  %v1295_v39 = vld [vmem:[#allocation2 + $0x2a0] ss:$8 sps:$4 sm:$0xff]  }
  0x31   :  { %724 = vmatprep.subr.bf16.mxu0 %v1200_v25  ;;  %681 = vmatprep.subr.bf16.mxu1 %v1262_v40  ;;  %v1271_v25 = vld [vmem:[#allocation2 + $0x260] ss:$8 sps:$4 sm:$0xff]   ;;  %v1303_v40 = vld [vmem:[#allocation2 + $0x2b4] ss:$8 sps:$4 sm:$0xff]  }
  0x34   :  { %725 = vmatpush1.bf16.msra.mxu0 %v1202_v26  ;;  %682 = vmatpush1.bf16.msra.mxu1 %v1264_v43  ;;  %v1279_v26 = vld [vmem:[#allocation2 + $0x274] ss:$8 sps:$4 sm:$0xff]   ;;  %v1307_v43 = vld [vmem:[#allocation2 + $0x2c0] ss:$8 sps:$4 sm:$0xff]  }
  0x35   :  { %726 = vmatprep.subr.bf16.mxu0 %v1203_v29  ;;  %683 = vmatprep.subr.bf16.mxu1 %v1268_v44  ;;  %v1277_v29 = vld [vmem:[#allocation2 + $0x270] ss:$8 sps:$4 sm:$0xff]   ;;  %v1315_v44 = vld [vmem:[#allocation2 + $0x2d4] ss:$8 sps:$4 sm:$0xff]  }
  0x38   :  { %727 = vmatpush1.bf16.msra.mxu0 %v1205_v30  ;;  %684 = vmatpush1.bf16.msra.mxu1 %v1270_v47  ;;  %v1332_v30 = vld [vmem:[%s1500_s3 + $0x48] sm:$0xff]  }
  0x39   :  { %728 = vmatprep.subr.bf16.mxu0 %v1206_v33  ;;  %685 = vmatprep.subr.bf16.mxu1 %v1274_v48  ;;  %v1283_v33 = vld [vmem:[#allocation2 + $0x280] ss:$8 sps:$4 sm:$0xff]   ;;  %v1326_v48 = vld [vmem:[#allocation2 + $0x2f4] ss:$8 sps:$4 sm:$0xff]  }
  0x3a   :  { %v1318_v47 = vld [vmem:[#allocation2 + $0x2e0] ss:$8 sps:$4 sm:$0xff]  }
  0x3c   :  { %729 = vmatpush1.bf16.msra.mxu0 %v1208_v34  ;;  %686 = vmatpush1.bf16.msra.mxu1 %v1276_v51  ;;  %v1334_v34 = vld [vmem:[%s1500_s3 + $0x50] sm:$0xff]   ;;  %v1336_v51 = vld [vmem:[%s1500_s3 + $0x58] sm:$0xff]  }
  0x3d   :  { %730 = vmatprep.subr.bf16.mxu0 %v1209_v37  ;;  %687 = vmatprep.subr.bf16.mxu1 %v1280_v52  ;;  %v1289_v37 = vld [vmem:[#allocation2 + $0x290] ss:$8 sps:$4 sm:$0xff]  }
  0x3e   :  { %v1337_v52 = vld [vmem:[%s1500_s3 + $0x18] sm:$0xff]  }
  0x40   :  { %731 = vmatpush1.bf16.msra.mxu0 %v1211_v38  ;;  %688 = vmatpush1.bf16.msra.mxu1 %v1282_v55  ;;  %v1297_v38 = vld [vmem:[#allocation2 + $0x2a4] ss:$8 sps:$4 sm:$0xff]  }
  0x41   :  { %732 = vmatprep.subr.bf16.mxu0 %v1212_v41  ;;  %689 = vmatprep.subr.bf16.mxu1 %v1286_v56  ;;  %v1301_v41 = vld [vmem:[#allocation2 + $0x2b0] ss:$8 sps:$4 sm:$0xff]   ;;  %v1340_v55 = vld [vmem:[%s1500_s3 + $0x68] sm:$0xff]  }
  0x42   :  { %v1341_v56 = vld [vmem:[%s1500_s3 + $0x28] sm:$0xff]  }
  0x44   :  { %733 = vmatpush1.bf16.msra.mxu0 %v1214_v42  ;;  %690 = vmatpush1.bf16.msra.mxu1 %v1288_v61  ;;  %v1309_v42 = vld [vmem:[#allocation2 + $0x2c4] ss:$8 sps:$4 sm:$0xff]  }
  0x45   :  { %734 = vmatprep.subr.bf16.mxu0 %v1215_v45  ;;  %691 = vmatprep.subr.bf16.mxu1 %v1292_v63  ;;  %v1313_v45 = vld [vmem:[#allocation2 + $0x2d0] ss:$8 sps:$4 sm:$0xff]  }
  0x48   :  { %735 = vmatpush1.bf16.msra.mxu0 %v1217_v46  ;;  %692 = vmatpush1.bf16.msra.mxu1 %v1294_v2  ;;  %v1320_v46 = vld [vmem:[#allocation2 + $0x2e4] ss:$8 sps:$4 sm:$0xff]  }
  0x49   :  { %736 = vmatprep.subr.bf16.mxu0 %v1221_v49  ;;  %693 = vmatprep.subr.bf16.mxu1 %v1298_v4  ;;  %v1324_v49 = vld [vmem:[#allocation2 + $0x2f0] ss:$8 sps:$4 sm:$0xff]  }
  0x4c   :  { %737 = vmatpush1.bf16.msra.mxu0 %v1223_v50  ;;  %694 = vmatpush1.bf16.msra.mxu1 %v1300_v9  ;;  %v1021_v50 = vcombine.low %v1431_v3, %v1431_v3 }
  0x4d   :  { %738 = vmatprep.subr.bf16.mxu0 %v1227_v53  ;;  %695 = vmatprep.subr.bf16.mxu1 %v1304_v10  ;;  %v1338_v53 = vld [vmem:[%s1500_s3 + $0x60] sm:$0xff]  }
  0x50   :  { %739 = vmatpush1.bf16.msra.mxu0 %v1229_v54  ;;  %696 = vmatpush1.bf16.msra.mxu1 %v1306_v11  ;;  %v1339_v54 = vld [vmem:[%s1500_s3 + $0x20] sm:$0xff]  }
  0x51   :  { %749 = vmatprep.subr.bf16.mxu0 %v1237_v57  ;;  %697 = vmatprep.subr.bf16.mxu1 %v1310_v13  ;;  %v1342_v57 = vld [vmem:[%s1500_s3 + $0x70] sm:$0xff]  }
  0x53   :  { %741 = vmatmul.mubr.bf16.vlgmr.msra.gmra.mrb[0].mxu0 %v1019_v60  ;;  %v1345_v60 = vld [vmem:[%s1500_s3 + $0x38] sm:$0xff]  }
  0x54   :  { %750 = vmatpush1.bf16.msra.mxu0 %v1235_v58  ;;  %781 = vmatprep.mubr.bf16.mxu0 %v1022_v5  ;;  %v1343_v58 = vld [vmem:[%s1500_s3 + $0x30] sm:$0xff]   ;;  %v139_v5 = vlaneseq }
  0x55   :  { %751 = vmatprep.subr.bf16.mxu0 %v1243_v0  ;;  %698 = vmatpush1.bf16.msra.mxu1 %v1312_v15 }
  0x56   :  { %790 = vmatprep.subr.bf16.mxu1 %v1323_v17 }
  0x58   :  { %752 = vmatpush1.bf16.msra.mxu0 %v1241_v1  ;;  %700 = vmatmul.mubr.bf16.vlgmr.msra.gmra.mrb[0].mxu1 %v1017_v19 }
  0x59   :  { %753 = vmatprep.subr.bf16.mxu0 %v1249_v6  ;;  %791 = vmatpush1.bf16.msra.mxu1 %v1321_v20  ;;  %v140_v6 = vshrl.u32 %v139_v5, 7 }
  0x5a   :  { %822 = vmatprep.mubr.bf16.mxu1 %v1373_v24  ;;  %1140 = vmatprep.subr.bf16.mxu1 %v1330_v22 }
  0x5b   :  { %v145_v9 = vsub.s32 1, %v140_v6 }
  0x5c   :  { %754 = vmatpush1.bf16.msra.mxu0 %v1247_v7  ;;  %v141_v7 = vsub.s32 0, %v140_v6 }
  0x5d   :  { %755 = vmatprep.subr.bf16.mxu0 %v1255_v8  ;;  %v137_v8 = vld [vmem:[%s1499_s2] sm:$0x3] }
  0x5e   :  { %v142_v10 = vrot.slane %v137_v8, %v141_v7  ;;  %v146_v11 = vrot.slane %v137_v8, %v145_v9 }
  0x60   :  { %756 = vmatpush1.bf16.msra.mxu0 %v1253_v12  ;;  %1122 = vmatmul.mubr.msk.bf16.vlgmr.msra.gmra.mrb[4].mxu1 %vm663_vm0, %v1329_v27  ;;  %v1123_v27 = vld [vmem:[%s1501_s4] ss:$0 sm:$0xff] }
  0x61   :  { %757 = vmatprep.subr.bf16.mxu0 %v1261_v14  ;;  %1141 = vmatpush3.bf16.msra.mxu1 %v1331_v28 }
  0x62   :  { %1142 = vmatprep.subr.bf16.mxu1 %v1332_v30 }
  0x64   :  { %758 = vmatpush1.bf16.msra.mxu0 %v1259_v16 }
  0x65   :  { %759 = vmatprep.subr.bf16.mxu0 %v1267_v18  ;;  %1143 = vmatpush3.bf16.msra.mxu1 %v1333_v32 }
  0x66   :  { %1144 = vmatprep.subr.bf16.mxu1 %v1334_v34 }
  0x68   :  { %760 = vmatpush1.bf16.msra.mxu0 %v1265_v21 }
  0x69   :  { %761 = vmatprep.subr.bf16.mxu0 %v1273_v23  ;;  %1145 = vmatpush3.bf16.msra.mxu1 %v1335_v36 }
  0x6a   :  { %1146 = vmatprep.subr.bf16.mxu1 %v1336_v51 }
  0x6c   :  { %762 = vmatpush1.bf16.msra.mxu0 %v1271_v25 }
  0x6d   :  { %763 = vmatprep.subr.bf16.mxu0 %v1279_v26  ;;  %1147 = vmatpush3.bf16.msra.mxu1 %v1337_v52 }
  0x6e   :  { %1148 = vmatprep.subr.bf16.mxu1 %v1338_v53 }
  0x70   :  { %764 = vmatpush1.bf16.msra.mxu0 %v1277_v29 }
  0x71   :  { %765 = vmatprep.subr.bf16.mxu0 %v1285_v31  ;;  %1149 = vmatpush3.bf16.msra.mxu1 %v1339_v54 }
  0x72   :  { %1150 = vmatprep.subr.bf16.mxu1 %v1340_v55 }
  0x74   :  { %766 = vmatpush1.bf16.msra.mxu0 %v1283_v33 }
  0x75   :  { %767 = vmatprep.subr.bf16.mxu0 %v1291_v35  ;;  %1151 = vmatpush3.bf16.msra.mxu1 %v1341_v56 }
  0x76   :  { %1152 = vmatprep.subr.bf16.mxu1 %v1342_v57 }
  0x78   :  { %768 = vmatpush1.bf16.msra.mxu0 %v1289_v37 }
  0x79   :  { %769 = vmatprep.subr.bf16.mxu0 %v1297_v38  ;;  %1153 = vmatpush3.bf16.msra.mxu1 %v1343_v58 }
  0x7a   :  { %1154 = vmatprep.subr.bf16.mxu1 %v1344_v59 }
  0x7c   :  { %770 = vmatpush1.bf16.msra.mxu0 %v1295_v39 }
  0x7d   :  { %771 = vmatprep.subr.bf16.mxu0 %v1303_v40  ;;  %1155 = vmatpush3.bf16.msra.mxu1 %v1345_v60 }
  0x80   :  { %772 = vmatpush1.bf16.msra.mxu0 %v1301_v41 }
  0x81   :  { %773 = vmatprep.subr.bf16.mxu0 %v1309_v42 }
  0x84   :  { %774 = vmatpush1.bf16.msra.mxu0 %v1307_v43 }
  0x85   :  { %775 = vmatprep.subr.bf16.mxu0 %v1315_v44 }
  0x88   :  { %776 = vmatpush1.bf16.msra.mxu0 %v1313_v45 }
  0x89   :  { %777 = vmatprep.subr.bf16.mxu0 %v1320_v46 }
  0x8c   :  { %778 = vmatpush1.bf16.msra.mxu0 %v1318_v47 }
  0x8d   :  { %779 = vmatprep.subr.bf16.mxu0 %v1326_v48 }
  0x90   :  { %780 = vmatpush1.bf16.msra.mxu0 %v1324_v49 }
  0x93   :  { %782 = vmatmul.mubr.bf16.vlgmr.msra.gmra.mrb[0].mxu0 %v1021_v50 }
 0x12b   :  { %v701_v61 = vpop.f32.mrb[0].mxu1 }
 0x12c   :  { %v703_v62 = vpop.f32.mrb[1].mxu1  ;;  %v702_v12 = vadd.f32 %v701_v61, %v142_v10 }
 0x12d   :  { %v705_v63 = vpop.f32.mrb[2].mxu1  ;;  %v704_v13 = vadd.f32 %v703_v62, %v146_v11 }
 0x12e   :  { %v706_v0 = vpop.f32.mrb[3].mxu1 }
 0x133   :  { %v824_v1 = vpop.f32.mrb[4].mxu1 }
 0x134   :  { %v826_v2 = vpop.f32.mrb[5].mxu1 }
 0x135   :  { %v828_v3 = vpop.f32.mrb[6].mxu1 }
 0x136   :  { %v829_v4 = vpop.f32.mrb[7].mxu1 }
 0x166   :  { %v783_v14 = vpop.f32.mrb[0].mxu0 }
 0x167   :  { %v1163_v15 = vadd.f32 %v783_v14, %v702_v12  ;;  %v785_v16 = vpop.f32.mrb[1].mxu0 }
 0x168   :  { %v1166_v17 = vadd.f32 %v785_v16, %v704_v13  ;;  %v787_v18 = vpop.f32.mrb[2].mxu0 }
 0x169   :  { %v1164_v19 = vadd.f32 %v1163_v15, %v824_v1  ;;  %v788_v20 = vpop.f32.mrb[3].mxu0 }
 0x16a   :  { %v1167_v21 = vadd.f32 %v1166_v17, %v826_v2 }
 0x16b   :  { %v831_v22 = vmax.f32 %v1164_v19, 0.0 }
 0x16c   :  { %v832_v23 = vmax.f32 %v1167_v21, 0.0 }
 0x16d   :  { %v833_v25 = vpack.c.bf16 %v831_v22, %v831_v22 }
 0x16e   :  { %v834_v24 = vpack.c.bf16 %v832_v23, %v832_v23 }
 0x170   :  { %1002 = vmatprep.mubr.bf16.mxu1 %v834_v24 }
 0x171   :  { %1003 = vmatmul.mubr.bf16.vlgmr.msra.gmra.mrb[8].mxu1 %v833_v25 }
 0x244   :  { %v1156_v26 = vpop.f32.mrb[8].mxu1 }
 0x245   :  { %v1157_v28 = vpop.f32.mrb[9].mxu1 }
 0x246   :  { %v1158_v29 = vadd.f32 %v1157_v28, %v1156_v26  ;;  %v1159_v30 = vpop.f32.mrb[10].mxu1 }
 0x247   :  { %v1160_v31 = vpop.f32.mrb[11].mxu1 }
 0x248   :  { %v1005_v32 = vadd.f32 %v1158_v29, %v1123_v27 }
 0x24a   :  { %v1010_v33 = vpack.c.bf16 %v1005_v32, %v1005_v32 }
 0x24c   :  { %1011 = vst [vmem:[%s1502_s5] sm:$0xf] %v1010_v33 }
 0x24d   :  { %1016 = vsyncpa [#allocation3], 1 }

</bundles_post_ra>
